<compile_context>
chip_gen: v5e
topology: v5e:2x2
jax: 0.10.0
libtpu: 0.0.40
codegen_flags: <defaults>
</compile_context>

<pallas_src>
import functools

import jax
import jax.numpy as jnp
from jax.experimental import pallas as pl
from jax.experimental.pallas import tpu as pltpu


PAD = 128  # lane width: all feature dims are zero-padded to this


def policy_mlp_kernel(x_ref, w_ref, b_ref, out_ref, *, action_size):
    """One [TB, 128] tile of states through the 3-layer MLP + softmax.

    x_ref:   [TB, 128]      states, zero-padded past state_size
    w_ref:   [3, 128, 128]  packed weights (layer l = w_ref[l]), zero-padded
    b_ref:   [3, 1, 128]    packed biases, zero-padded
    out_ref: [TB, 128]      action probabilities in lanes [0, action_size)
    """
    x = x_ref[...]

    # Zero padding makes the padded lanes/rows inert: padded input columns hit
    # zero weight rows, padded hidden lanes stay exactly 0 through ReLU.
    h1 = jnp.dot(x, w_ref[0], preferred_element_type=jnp.float32) + b_ref[0]
    h1 = jnp.maximum(h1, 0.0)

    h2 = jnp.dot(h1, w_ref[1], preferred_element_type=jnp.float32) + b_ref[1]
    h2 = jnp.maximum(h2, 0.0)

    logits = jnp.dot(h2, w_ref[2], preferred_element_type=jnp.float32) + b_ref[2]

    # Mask the padded action lanes out of the softmax normalization.
    col = jax.lax.broadcasted_iota(jnp.int32, logits.shape, 1)
    logits = jnp.where(col < action_size, logits, jnp.float32(-1e30))

    m = jnp.max(logits, axis=-1, keepdims=True)
    e = jnp.exp(logits - m)
    denom = jnp.sum(e, axis=-1, keepdims=True)
    out_ref[...] = e * pl.reciprocal(denom, approx=True)


def pack_params(params):
    """Pack (w1,b1,w2,b2,w3,b3) into two zero-padded, lane-dense slabs.

    Weights are stored [in, out] (transpose of torch's [out, in]).
    Returns w_packed [3, PAD, PAD] and b_packed [3, 1, PAD].
    """
    w1, b1, w2, b2, w3, b3 = params

    def pad_w(w):
        fi, fo = w.shape
        assert fi <= PAD and fo <= PAD, "layer dims must be <= 128 for this packing"
        return jnp.zeros((PAD, PAD), jnp.float32).at[:fi, :fo].set(w.astype(jnp.float32))

    def pad_b(b):
        b = b.reshape(-1).astype(jnp.float32)
        return jnp.zeros((1, PAD), jnp.float32).at[0, : b.shape[0]].set(b)

    w_packed = jnp.stack([pad_w(w1), pad_w(w2), pad_w(w3)])
    b_packed = jnp.stack([pad_b(b1), pad_b(b2), pad_b(b3)])
    return w_packed, b_packed


def policy_network_forward_batched(states, w_packed, b_packed, action_size, tb=128):
    """states: [B, state_size] f32 -> action probabilities [B, action_size]."""
    B, S = states.shape
    b_pad = pl.cdiv(B, tb) * tb

    # Lane-dense, zero-padded input slab.
    x = jnp.zeros((b_pad, PAD), jnp.float32).at[:B, :S].set(states.astype(jnp.float32))

    kernel = functools.partial(policy_mlp_kernel, action_size=action_size)

    out = pl.pallas_call(
        kernel,
        out_shape=jax.ShapeDtypeStruct((b_pad, PAD), jnp.float32),
        grid=(b_pad // tb,),
        in_specs=[
            pl.BlockSpec((tb, PAD), lambda i: (i, 0)),          # state tile per step
            pl.BlockSpec((3, PAD, PAD), lambda i: (0, 0, 0)),   # weights: resident
            pl.BlockSpec((3, 1, PAD), lambda i: (0, 0, 0)),     # biases: resident
        ],
        out_specs=pl.BlockSpec((tb, PAD), lambda i: (i, 0)),
        compiler_params=pltpu.CompilerParams(
            dimension_semantics=("parallel",)),                  # v7x: 2 TCs
    )(x, w_packed, b_packed)

    return out[:B, :action_size]


def policy_network_forward(state, w_packed, b_packed, action_size):
    """Single-state call convention of the torch module: [state_size] -> [action_size]."""
    probs = policy_network_forward_batched(
        state.reshape(1, -1), w_packed, b_packed, action_size, tb=8)
    return probs[0]


def init_params(key, state_size, fc1_size, fc2_size, action_size):
    """Deterministic init mimicking torch.nn.Linear default U[-1/sqrt(in), 1/sqrt(in)].

    Weights stored as [in, out] (transpose of torch's [out, in])."""
    def linear(k, fan_in, fan_out):
        kw, kb = jax.random.split(k)
        bound = 1.0 / jnp.sqrt(float(fan_in))
        w = jax.random.uniform(kw, (fan_in, fan_out), jnp.float32, -bound, bound)
        b = jax.random.uniform(kb, (1, fan_out), jnp.float32, -bound, bound)
        return w, b

    k1, k2, k3 = jax.random.split(key, 3)
    w1, b1 = linear(k1, state_size, fc1_size)
    w2, b2 = linear(k2, fc1_size, fc2_size)
    w3, b3 = linear(k3, fc2_size, action_size)
    return (w1, b1, w2, b2, w3, b3)


def reference_forward_batched(states, params):
    w1, b1, w2, b2, w3, b3 = params
    h1 = jnp.maximum(states @ w1 + b1, 0.0)
    h2 = jnp.maximum(h1 @ w2 + b2, 0.0)
    logits = h2 @ w3 + b3
    return jax.nn.softmax(logits, axis=-1)


if __name__ == "__main__":
    state_size, fc1_size, fc2_size, action_size = 16, 32, 32, 8
    batch = 256  # 2 grid steps of TB=128

    key = jax.random.PRNGKey(0)
    k_params, k_state = jax.random.split(key)

    params = init_params(k_params, state_size, fc1_size, fc2_size, action_size)
    w_packed, b_packed = pack_params(params)
    states = jax.random.normal(k_state, (batch, state_size), jnp.float32)

    # Batched rollout path.
    probs = policy_network_forward_batched(states, w_packed, b_packed, action_size)
    probs = jax.block_until_ready(probs)

    ref = reference_forward_batched(states, params)
    assert probs.shape == (batch, action_size)
    assert jnp.allclose(jnp.sum(probs, axis=-1), 1.0, atol=5e-3)
    assert jnp.allclose(probs, ref, atol=2e-3, rtol=5e-3)

    # Single-state path (the torch module's literal call convention).
    p1 = policy_network_forward(states[0], w_packed, b_packed, action_size)
    p1 = jax.block_until_ready(p1)
    assert p1.shape == (action_size,)
    assert jnp.allclose(p1, ref[0], atol=2e-3, rtol=5e-3)

    # TODO(synk): torch.distributions.Categorical(x) is a Python distribution
    # object (sampling / log_prob), not a tensor op; the kernel returns the
    # probability vectors that fully parameterize it.

    print("KERNEL_OK")
</pallas_src>

<mosaic_0001>
module attributes {stable_mosaic.version = 11 : i64} {
  func.func @policy_mlp_kernel(%arg0: i32, %arg1: memref<128x128xf32, #tpu.memory_space<vmem>>, %arg2: memref<3x128x128xf32, #tpu.memory_space<vmem>>, %arg3: memref<3x1x128xf32, #tpu.memory_space<vmem>>, %arg4: memref<128x128xf32, #tpu.memory_space<vmem>>) attributes {dimension_semantics = [#tpu.dimension_semantics<parallel>], iteration_bounds = array<i64: 2>, scalar_prefetch = 0 : i64, scratch_operands = 0 : i64, tpu.core_type = #tpu.core_type<tc>, window_params = [{transform_indices = @transform_0, window_bounds = array<i64: 128, 128>}, {pipeline_mode = #tpu.pipeline_mode<synchronous>, transform_indices = @transform_1, window_bounds = array<i64: 3, 128, 128>}, {pipeline_mode = #tpu.pipeline_mode<synchronous>, transform_indices = @transform_2, window_bounds = array<i64: 3, 1, 128>}, {transform_indices = @transform_3, window_bounds = array<i64: 128, 128>}]} {
    %c0 = arith.constant 0 : index
    %c0_0 = arith.constant 0 : index
    %0 = vector.load %arg1[%c0, %c0_0] : memref<128x128xf32, #tpu.memory_space<vmem>>, vector<128x128xf32>
    %c0_1 = arith.constant 0 : index
    %c0_2 = arith.constant 0 : index
    %c0_3 = arith.constant 0 : index
    %1 = vector.load %arg2[%c0_1, %c0_2, %c0_3] : memref<3x128x128xf32, #tpu.memory_space<vmem>>, vector<1x128x128xf32>
    %2 = vector.shape_cast %1 : vector<1x128x128xf32> to vector<128x128xf32>
    %cst = arith.constant dense<0.000000e+00> : vector<128x128xf32>
    %3 = tpu.matmul %0, %2, %cst {dimension_numbers = #tpu.dot_dimension_numbers<[1], [0], [0], [1], [0, 0, 1, 1], [], []>} : vector<128x128xf32>, vector<128x128xf32>, vector<128x128xf32> -> vector<128x128xf32>
    %c0_4 = arith.constant 0 : index
    %c0_5 = arith.constant 0 : index
    %c0_6 = arith.constant 0 : index
    %4 = vector.load %arg3[%c0_4, %c0_5, %c0_6] : memref<3x1x128xf32, #tpu.memory_space<vmem>>, vector<1x1x128xf32>
    %5 = vector.shape_cast %4 : vector<1x1x128xf32> to vector<1x128xf32>
    %6 = vector.broadcast %5 : vector<1x128xf32> to vector<128x128xf32>
    %7 = arith.addf %3, %6 : vector<128x128xf32>
    %cst_7 = arith.constant 0.000000e+00 : f32
    %8 = vector.broadcast %cst_7 : f32 to vector<128x128xf32>
    %9 = arith.maximumf %7, %8 : vector<128x128xf32>
    %c1 = arith.constant 1 : index
    %c0_8 = arith.constant 0 : index
    %c0_9 = arith.constant 0 : index
    %10 = vector.load %arg2[%c1, %c0_8, %c0_9] : memref<3x128x128xf32, #tpu.memory_space<vmem>>, vector<1x128x128xf32>
    %11 = vector.shape_cast %10 : vector<1x128x128xf32> to vector<128x128xf32>
    %cst_10 = arith.constant dense<0.000000e+00> : vector<128x128xf32>
    %12 = tpu.matmul %9, %11, %cst_10 {dimension_numbers = #tpu.dot_dimension_numbers<[1], [0], [0], [1], [0, 0, 1, 1], [], []>} : vector<128x128xf32>, vector<128x128xf32>, vector<128x128xf32> -> vector<128x128xf32>
    %c1_11 = arith.constant 1 : index
    %c0_12 = arith.constant 0 : index
    %c0_13 = arith.constant 0 : index
    %13 = vector.load %arg3[%c1_11, %c0_12, %c0_13] : memref<3x1x128xf32, #tpu.memory_space<vmem>>, vector<1x1x128xf32>
    %14 = vector.shape_cast %13 : vector<1x1x128xf32> to vector<1x128xf32>
    %15 = vector.broadcast %14 : vector<1x128xf32> to vector<128x128xf32>
    %16 = arith.addf %12, %15 : vector<128x128xf32>
    %cst_14 = arith.constant 0.000000e+00 : f32
    %17 = vector.broadcast %cst_14 : f32 to vector<128x128xf32>
    %18 = arith.maximumf %16, %17 : vector<128x128xf32>
    %c2 = arith.constant 2 : index
    %c0_15 = arith.constant 0 : index
    %c0_16 = arith.constant 0 : index
    %19 = vector.load %arg2[%c2, %c0_15, %c0_16] : memref<3x128x128xf32, #tpu.memory_space<vmem>>, vector<1x128x128xf32>
    %20 = vector.shape_cast %19 : vector<1x128x128xf32> to vector<128x128xf32>
    %cst_17 = arith.constant dense<0.000000e+00> : vector<128x128xf32>
    %21 = tpu.matmul %18, %20, %cst_17 {dimension_numbers = #tpu.dot_dimension_numbers<[1], [0], [0], [1], [0, 0, 1, 1], [], []>} : vector<128x128xf32>, vector<128x128xf32>, vector<128x128xf32> -> vector<128x128xf32>
    %c2_18 = arith.constant 2 : index
    %c0_19 = arith.constant 0 : index
    %c0_20 = arith.constant 0 : index
    %22 = vector.load %arg3[%c2_18, %c0_19, %c0_20] : memref<3x1x128xf32, #tpu.memory_space<vmem>>, vector<1x1x128xf32>
    %23 = vector.shape_cast %22 : vector<1x1x128xf32> to vector<1x128xf32>
    %24 = vector.broadcast %23 : vector<1x128xf32> to vector<128x128xf32>
    %25 = arith.addf %21, %24 : vector<128x128xf32>
    %26 = tpu.iota {dimensions = array<i32: 1>} : vector<128x128xi32>
    %c8_i32 = arith.constant 8 : i32
    %27 = vector.broadcast %c8_i32 : i32 to vector<128x128xi32>
    %28 = arith.cmpi slt, %26, %27 : vector<128x128xi32>
    %cst_21 = arith.constant -1.000000e+30 : f32
    %29 = vector.broadcast %cst_21 : f32 to vector<128x128xf32>
    %30 = arith.select %28, %25, %29 : vector<128x128xi1>, vector<128x128xf32>
    %cst_22 = arith.constant dense<0xFF800000> : vector<128xf32>
    %31 = vector.multi_reduction <maximumf>, %30, %cst_22 [1] : vector<128x128xf32> to vector<128xf32>
    %32 = vector.shape_cast %31 : vector<128xf32> to vector<128x1xf32>
    %33 = vector.broadcast %32 : vector<128x1xf32> to vector<128x128xf32>
    %34 = arith.subf %30, %33 : vector<128x128xf32>
    %35 = math.exp %34 : vector<128x128xf32>
    %cst_23 = arith.constant dense<0.000000e+00> : vector<128xf32>
    %36 = vector.multi_reduction <add>, %35, %cst_23 [1] : vector<128x128xf32> to vector<128xf32>
    %37 = vector.shape_cast %36 : vector<128xf32> to vector<128x1xf32>
    %38 = tpu.reciprocal %37 {approx = true} : vector<128x1xf32> -> vector<128x1xf32>
    %39 = vector.broadcast %38 : vector<128x1xf32> to vector<128x128xf32>
    %40 = arith.mulf %35, %39 : vector<128x128xf32>
    %c0_24 = arith.constant 0 : index
    %c0_25 = arith.constant 0 : index
    %41 = vector.load %arg4[%c0_24, %c0_25] : memref<128x128xf32, #tpu.memory_space<vmem>>, vector<128x128xf32>
    tpu.vector_store %arg4[%c0_24, %c0_25], %40 {strides = array<i32>} : memref<128x128xf32, #tpu.memory_space<vmem>>, vector<128x128xf32>,
    return
  }
  func.func @transform_0(%arg0: i32) -> (i32, i32) {
    %c0_i32 = arith.constant 0 : i32
    %c0_i32_0 = arith.constant 0 : i32
    return %arg0, %c0_i32 : i32, i32
  }
  func.func @transform_1(%arg0: i32) -> (i32, i32, i32) {
    %c0_i32 = arith.constant 0 : i32
    %c0_i32_0 = arith.constant 0 : i32
    %c0_i32_1 = arith.constant 0 : i32
    %c0_i32_2 = arith.constant 0 : i32
    return %c0_i32, %c0_i32_0, %c0_i32_1 : i32, i32, i32
  }
  func.func @transform_2(%arg0: i32) -> (i32, i32, i32) {
    %c0_i32 = arith.constant 0 : i32
    %c0_i32_0 = arith.constant 0 : i32
    %c0_i32_1 = arith.constant 0 : i32
    %c0_i32_2 = arith.constant 0 : i32
    return %c0_i32, %c0_i32_0, %c0_i32_1 : i32, i32, i32
  }
  func.func @transform_3(%arg0: i32) -> (i32, i32) {
    %c0_i32 = arith.constant 0 : i32
    %c0_i32_0 = arith.constant 0 : i32
    return %arg0, %c0_i32 : i32, i32
  }
}

</mosaic_0001>

<bundles_post_ra>
// kernel: tpu_custom_call.1
= control target key start
LH: loop header
LB: loop body
LE: loop exit
PB: predicated region body
PF: predicated region fallthrough
CT: control target
= control target key end

     0   :  { %8 = vsyncpa [#allocation3], 0  ;;  %s1605_s0 = inlined_call_operand.hbm [shape: f32[256,128], index: 0, kind: input, shape index: {}]   ;;  %s1606_s1 = inlined_call_operand.hbm [shape: f32[3,128,128], index: 1, kind: input, shape index: {}]   ;;  %s1607_s2 = inlined_call_operand.hbm [shape: f32[3,1,128], index: 2, kind: input, shape index: {}]   ;;  %s1608_s3 = inlined_call_operand.hbm [shape: f32[256,128], index: 3, kind: output, shape index: {}]  }
   0x1   :  { %10 = vsyncpa [#allocation3 + $0x1], 0 }
   0x2   :  { %11 = vsyncpa [#allocation6], 0 }
   0x3   :  { %12 = vsyncpa [#allocation4], 0 }
   0x4   :  { %14 = vsyncpa [#allocation4 + $0x1], 0  ;;  %s1218_s12 = smov 0   ;;  %s1220_s13 = smov 0  }
   0x5   :  { %s1222_s14 = smov 0   ;;  %s1224_s15 = smov 0  }
   0x6 LB: > { %s1239_s16 = sadd.s32 4294967295, %s1188_s15   ;;  %s820_s17 = sadd.s32 4294967294, %s1188_s15   ;;  %s1188_s15 = sphi %s1224_s15, %s1618_s15   ;;  %s1184_s14 = sphi %s1222_s14, %s1617_s14   ;;  %s1180_s13 = sphi %s1220_s13, %s1616_s13   ;;  %s1176_s12 = sphi %s1218_s12, %s1615_s12  }
   0x7   : > { %p40_p0 = scmp.ne.s32.totalorder %s1180_s13, %s1176_s12  ;;  %p41_p1 = scmp.eq.s32.totalorder %s1239_s16, 0 }
   0x8   : > { %p106_p2 = scmp.eq.s32.totalorder %s1239_s16, 1  ;;  %p112_p3 = scmp.eq.s32.totalorder %s820_s17, 1 }
   0x9   : > { %p1248_p4 = por %p41_p1, %p40_p0  ;;  %p821_p5 = scmp.ge.s32.totalorder %s1188_s15, 1 }
   0xa   : > { %p1253_p6 = por %p112_p3, %p40_p0  ;;  %p119_p7 = scmp.lt.s32.totalorder %s1188_s15, 3 }
   0xb   : > { %s130_s22 = sshll.u32 %s1606_s1, 4  ;;  %s1190_s24 = smov [#allocation5]   ;;  %s131_s22 = int_to_ptr.hbm [resolvable:$true] %s130_s22 }
   0xc   : > { %p1261_p8 = pnand %p821_p5, %p119_p7  ;;  %s132_s25 = sshll.u32 %s1190_s24, 4  ;;  %s133_s25 = int_to_ptr.vmem [resolvable:$true] %s132_s25 }
   0xd   : > { %s144_s28 = sshll.u32 %s1607_s2, 4  ;;  %s1191_s29 = smov 128   ;;  %s145_s28 = int_to_ptr.hbm [resolvable:$true] %s144_s28 }
   0xe   : > { %p900_p9 = pneg %p1261_p8  ;;  %s1192_s30 = smov 8  }
   0xf   : > { %s1193_s4 = smov [#allocation7]   ;;  %s1194_s6 = smov 16  }
  0x10   : > { %p901_p10 = pnand %p900_p9, %p41_p1  ;;  %s146_s5 = sshll.u32 %s1193_s4, 4  ;;  %s147_s5 = int_to_ptr.vmem [resolvable:$true] %s146_s5 }
  0x11   : > { %s1195_s7 = smov 1   ;;  %s1277_s8 = sadd.s32 1, %s1188_s15  }
  0x12   : > { %903 = dma.hbm_to_vmem [thread:$0]  (!%p901_p10), %s131_s22, 6144, %s133_s25, [#allocation6], %s1191_s29, %s1191_s29, %s1192_s30  }
  0x13   : > { %906 = dma.hbm_to_vmem [thread:$0]  (!%p901_p10), %s145_s28, 48, %s147_s5, [#allocation6], %s1194_s6, %s1194_s6, %s1195_s7  }
  0x14   : > { %s24_s9 = ssub.s32 %s1188_s15, %s1277_s8  ;;  %s27_s10 = sadd.s32 1, %s1184_s14 }
  0x15   : > { %p25_p12 = scmp.eq.s32.totalorder %s24_s9, 0  ;;  %p34_p13 = scmp.ne.s32.totalorder %s1184_s14, %s1180_s13 }
  0x16   : > { %p35_p0 = scmp.eq.s32.totalorder %s1188_s15, 0  ;;  %p917_p7 = scmp.lt.s32.totalorder %s1188_s15, 2 }
  0x17   : > { %s1286_s11 = scalar_select %p25_p12, %s1184_s14, %s27_s10  }
  0x18   : > { %p36_p3 = por %p35_p0, %p34_p13  ;;  %p1290_p5 = por %p106_p2, %p34_p13 }
  0x19   : > { %s160_s20 = sand.u32 1, %s1184_s14   ;;  %s838_s22 = sshll.u32 %s1188_s15, 7 }
  0x1a   : > { %s825_s21 = sshll.u32 %s160_s20, 7  ;;  %s169_s26 = scalar_lea.hbm %s1605_s0, %s838_s22 }
  0x1b   : > { %s164_s27 = scalar_lea.vmem [#allocation2], %s825_s21  ;;  %s170_s4 = sshll.u32 %s169_s26, 4  ;;  %s171_s4 = int_to_ptr.hbm [resolvable:$true] %s170_s4 }
  0x1c   : > { %s172_s28 = sshll.u32 %s164_s27, 4  ;;  %p1300_p9 = pnand %p917_p7, %p36_p3  ;;  %s173_s28 = int_to_ptr.vmem [resolvable:$true] %s172_s28 }
  0x1d   : > { %s161_s6 = scalar_lea.sflag [#allocation3], %s160_s20  ;;  %s1088_s7 = sshra.s32 %s171_s4, 4  ;;  %s1089_s7 = int_to_ptr.hbm [resolvable:$true] %s1088_s7 }
  0x1e   : > { %s1090_s9 = scalar_lea.hbm %s1089_s7, 128  ;;  %p1092_p10 = pneg %p1300_p9 }
  0x1f   : > { %p1091_p2 = scmp.ne.s32.totalorder %s1089_s7, %s1090_s9  ;;  %s1095_s22 = scalar_lea.hbm %s1605_s0, 256 }
  0x20   : > { %p1096_p0 = scmp.lt.s32.totalorder %s1089_s7, %s1605_s0  ;;  %p1097_p3 = scmp.lt.s32.totalorder %s1095_s22, %s1090_s9 }
  0x21   : > { %p1093_p12 = pnand %p1092_p10, %p1091_p2 }
  0x22   : > { %p1098_p7 = por %p1097_p3, %p1096_p0 }
  0x23   : > { %p1094_p13 = pneg %p1093_p12 }
  0x25   : > { %p1099_p11 = pnand %p1098_p7, %p1094_p13 }
  0x27   : > { %1102 = shalt.err (!%p1099_p11)
}
  0x28   : > { %910 = dma.hbm_to_vmem [thread:$0]  (!%p1300_p9), %s171_s4, 2048, %s173_s28, %s161_s6, %s1191_s29, %s1191_s29, %s1192_s30  }
  0x29   : > { %184 = sbr.rel (%p1261_p8) target bundleno = 828 (0x33c), region = 32  ;;  %s1320_s20 = sand.u32 (!%p1261_p8), 1, %s1180_s13  }
  0x2a   : > { %s829_s26 = sshll.u32 (!%p1261_p8), %s1320_s20, 7  ;;  %s187_s27 = scalar_lea.sflag (!%p1261_p8), [#allocation3], %s1320_s20 }
  0x2b   : > { %s1326_s7 = scalar_lea.vmem (!%p1261_p8), [#allocation2], %s829_s26 }
  0x2e   : > { %1163 = dma.done.wait (%p1248_p4), %s187_s27, 2048  }
  0x2f   : > { %1165 = vsyncadd (%p1248_p4), %s187_s27, 4294965248 }
  0x30   : > { %1167 = dma.done.wait (%p41_p1), [#allocation6], 6192  }
  0x31   : > { %1169 = vsyncadd (%p41_p1), [#allocation6], 4294961104  ;;  %v257_v0 = vld [vmem:[#allocation5 + $0x78] sm:$0xff]  ;;  %v256_v1 = vld [vmem:[#allocation5 + $0x70] sm:$0xff]  ;;  %s1538_s18 = scalar_lea.vmem [#allocation8], %s829_s26  ;;  %s839_s23 = sshll.u32 %s1239_s16, 7 }
  0x32   : > { %262 = vmatpush.msra.mxu0 %v257_v0  ;;  %840 = vmatpush.msra.mxu3 %v257_v0  ;;  %v255_v2 = vld [vmem:[#allocation5 + $0x68] sm:$0xff]  ;;  %v254_v3 = vld [vmem:[#allocation5 + $0x60] sm:$0xff]  ;;  %v253_v4 = vld [vmem:[#allocation5 + $0x58] sm:$0xff]  ;;  %s724_s28 = scalar_lea.hbm %s1608_s3, %s839_s23  ;;  %s725_s4 = sshll.u32 %s1538_s18, 4  ;;  %s726_s4 = int_to_ptr.vmem [resolvable:$true] %s725_s4 }
  0x33   : > { %v252_v5 = vld [vmem:[#allocation5 + $0x50] sm:$0xff]  ;;  %v251_v6 = vld [vmem:[#allocation5 + $0x48] sm:$0xff]  ;;  %v250_v7 = vld [vmem:[#allocation5 + $0x40] sm:$0xff]  ;;  %s727_s5 = sshll.u32 %s724_s28, 4  ;;  %s713_s16 = scalar_lea.sflag [#allocation4], %s1320_s20  ;;  %s728_s5 = int_to_ptr.hbm [resolvable:$true] %s727_s5 }
  0x34   : > { %263 = vmatpush.msra.mxu0 %v256_v1  ;;  %841 = vmatpush.msra.mxu3 %v256_v1  ;;  %v249_v8 = vld [vmem:[#allocation5 + $0x38] sm:$0xff]  ;;  %v248_v9 = vld [vmem:[#allocation5 + $0x30] sm:$0xff]  ;;  %v247_v10 = vld [vmem:[#allocation5 + $0x28] sm:$0xff]  ;;  %s1132_s6 = sshra.s32 %s728_s5, 4  ;;  %s1138_s22 = scalar_lea.hbm %s1608_s3, 256  ;;  %s1133_s6 = int_to_ptr.hbm [resolvable:$true] %s1132_s6 }
  0x35   : > { %v246_v11 = vld [vmem:[#allocation5 + $0x20] sm:$0xff]  ;;  %v245_v12 = vld [vmem:[#allocation5 + $0x18] sm:$0xff]  ;;  %v244_v13 = vld [vmem:[#allocation5 + $0x10] sm:$0xff]  ;;  %s1134_s9 = scalar_lea.hbm %s1133_s6, 128  ;;  %p1139_p11 = scmp.lt.s32.totalorder %s1133_s6, %s1608_s3 }
  0x36   : > { %264 = vmatpush.msra.mxu0 %v255_v2  ;;  %842 = vmatpush.msra.mxu3 %v255_v2  ;;  %v243_v14 = vld [vmem:[#allocation5 + $0x8] sm:$0xff]  ;;  %v242_v15 = vld [vmem:[#allocation5] sm:$0xff]  ;;  %v228_v19 = vld [vmem:[%s1326_s7 + $0x10] sm:$0xff]  ;;  %p1135_p1 = scmp.ne.s32.totalorder %s1133_s6, %s1134_s9  ;;  %p1140_p9 = scmp.lt.s32.totalorder %s1138_s22, %s1134_s9 }
  0x37   : > { %v226_v16 = vld [vmem:[%s1326_s7] sm:$0xff]  ;;  %v227_v18 = vld [vmem:[%s1326_s7 + $0x8] sm:$0xff]  ;;  %v229_v21 = vld [vmem:[%s1326_s7 + $0x18] sm:$0xff] }
  0x38   : > { %265 = vmatpush.msra.mxu0 %v254_v3  ;;  %843 = vmatpush.msra.mxu3 %v254_v3  ;;  %v238_v17 = vld [vmem:[%s1326_s7 + $0x60] sm:$0xff]  ;;  %v239_v20 = vld [vmem:[%s1326_s7 + $0x68] sm:$0xff]  ;;  %v240_v22 = vld [vmem:[%s1326_s7 + $0x70] sm:$0xff]  ;;  %p1136_p4 = pnand %p1135_p1, %p1290_p5  ;;  %p1141_p2 = por %p1140_p9, %p1139_p11 }
  0x39   : > { %v230_v23 = vld [vmem:[%s1326_s7 + $0x20] sm:$0xff]  ;;  %v241_v24 = vld [vmem:[%s1326_s7 + $0x78] sm:$0xff]  ;;  %v231_v25 = vld [vmem:[%s1326_s7 + $0x28] sm:$0xff] }
  0x3a   : > { %266 = vmatpush.msra.mxu0 %v253_v4  ;;  %844 = vmatpush.msra.mxu3 %v253_v4  ;;  %v232_v26 = vld [vmem:[%s1326_s7 + $0x30] sm:$0xff]  ;;  %v233_v27 = vld [vmem:[%s1326_s7 + $0x38] sm:$0xff]  ;;  %v357_v30 = vld [vmem:[#allocation5 + $0xe8] sm:$0xff]  ;;  %p1137_p8 = pneg %p1136_p4 }
  0x3b   : > { %v359_v28 = vld [vmem:[#allocation5 + $0xf8] sm:$0xff]  ;;  %v358_v29 = vld [vmem:[#allocation5 + $0xf0] sm:$0xff]  ;;  %v356_v31 = vld [vmem:[#allocation5 + $0xe0] sm:$0xff] }
  0x3c   : > { %267 = vmatpush.msra.mxu0 %v252_v5  ;;  %845 = vmatpush.msra.mxu3 %v252_v5  ;;  %v234_v32 = vld [vmem:[%s1326_s7 + $0x40] sm:$0xff]  ;;  %v355_v33 = vld [vmem:[#allocation5 + $0xd8] sm:$0xff]  ;;  %v354_v34 = vld [vmem:[#allocation5 + $0xd0] sm:$0xff]  ;;  %p1142_p10 = pnand %p1141_p2, %p1137_p8 }
  0x3d   : > { %365 = vmatpush.msra.mxu1 %v359_v28  ;;  %v353_v35 = vld [vmem:[#allocation5 + $0xc8] sm:$0xff]  ;;  %v352_v36 = vld [vmem:[#allocation5 + $0xc0] sm:$0xff]  ;;  %v351_v38 = vld [vmem:[#allocation5 + $0xb8] sm:$0xff] }
  0x3e   : > { %268 = vmatpush.msra.mxu0 %v251_v6  ;;  %846 = vmatpush.msra.mxu3 %v251_v6  ;;  %v235_v37 = vld [vmem:[%s1326_s7 + $0x48] sm:$0xff]  ;;  %v350_v39 = vld [vmem:[#allocation5 + $0xb0] sm:$0xff]  ;;  %v348_v41 = vld [vmem:[#allocation5 + $0xa0] sm:$0xff] }
  0x3f   : > { %366 = vmatpush.msra.mxu1 %v358_v29  ;;  %v349_v40 = vld [vmem:[#allocation5 + $0xa8] sm:$0xff]  ;;  %v236_v42 = vld [vmem:[%s1326_s7 + $0x50] sm:$0xff]  ;;  %v347_v43 = vld [vmem:[#allocation5 + $0x98] sm:$0xff] }
  0x40   : > { %269 = vmatpush.msra.mxu0 %v250_v7  ;;  %847 = vmatpush.msra.mxu3 %v250_v7  ;;  %v237_v44 = vld [vmem:[%s1326_s7 + $0x58] sm:$0xff]  ;;  %v346_v45 = vld [vmem:[#allocation5 + $0x90] sm:$0xff]  ;;  %v345_v46 = vld [vmem:[#allocation5 + $0x88] sm:$0xff] }
  0x41   : > { %367 = vmatpush.msra.mxu1 %v357_v30  ;;  %v344_v47 = vld [vmem:[#allocation5 + $0x80] sm:$0xff] }
  0x42   : > { %270 = vmatpush.msra.mxu0 %v249_v8  ;;  %848 = vmatpush.msra.mxu3 %v249_v8  ;;  %v1352_v48 = vld [vmem:[#allocation7] ss:$0 sm:$0xff] }
  0x43   : > { %368 = vmatpush.msra.mxu1 %v356_v31 }
  0x44   : > { %271 = vmatpush.msra.mxu0 %v248_v9  ;;  %849 = vmatpush.msra.mxu3 %v248_v9 }
  0x45   : > { %369 = vmatpush.msra.mxu1 %v355_v33 }
  0x46   : > { %272 = vmatpush.msra.mxu0 %v247_v10  ;;  %850 = vmatpush.msra.mxu3 %v247_v10 }
  0x47   : > { %370 = vmatpush.msra.mxu1 %v354_v34 }
  0x48   : > { %273 = vmatpush.msra.mxu0 %v246_v11  ;;  %851 = vmatpush.msra.mxu3 %v246_v11 }
  0x49   : > { %371 = vmatpush.msra.mxu1 %v353_v35 }
  0x4a   : > { %274 = vmatpush.msra.mxu0 %v245_v12  ;;  %852 = vmatpush.msra.mxu3 %v245_v12 }
  0x4b   : > { %372 = vmatpush.msra.mxu1 %v352_v36 }
  0x4c   : > { %275 = vmatpush.msra.mxu0 %v244_v13  ;;  %853 = vmatpush.msra.mxu3 %v244_v13 }
  0x4d   : > { %373 = vmatpush.msra.mxu1 %v351_v38 }
  0x4e   : > { %276 = vmatpush.msra.mxu0 %v243_v14  ;;  %854 = vmatpush.msra.mxu3 %v243_v14 }
  0x4f   : > { %374 = vmatpush.msra.mxu1 %v350_v39 }
  0x50   : > { %277 = vmatpush.msra.mxu0 %v242_v15  ;;  %855 = vmatpush.msra.mxu3 %v242_v15 }
  0x51   : > { %278 = vmatmul.f32.vlgmr.msra.gmra.mxu0 %v226_v16  ;;  %314 = vmatmul.f32.vlgmr.msra.gmra.mxu3 %v238_v17 }
  0x52   : > { %856 = vmatpush.msrb.mxu3 %v359_v28  ;;  %375 = vmatpush.msra.mxu1 %v349_v40  ;;  %v458_v28 = vld [vmem:[#allocation5 + $0x158] sm:$0xff] }
  0x54   : > { %857 = vmatpush.msrb.mxu3 %v358_v29  ;;  %376 = vmatpush.msra.mxu1 %v348_v41  ;;  %v457_v29 = vld [vmem:[#allocation5 + $0x150] sm:$0xff] }
  0x56   : > { %858 = vmatpush.msrb.mxu3 %v357_v30  ;;  %377 = vmatpush.msra.mxu1 %v347_v43  ;;  %v456_v30 = vld [vmem:[#allocation5 + $0x148] sm:$0xff] }
  0x58   : > { %859 = vmatpush.msrb.mxu3 %v356_v31  ;;  %378 = vmatpush.msra.mxu1 %v346_v45 }
  0x59   : > { %281 = vmatmul.f32.gmra.mxu0 %v227_v18  ;;  %317 = vmatmul.f32.gmra.mxu3 %v239_v20 }
  0x5a   : > { %860 = vmatpush.msrb.mxu3 %v355_v33  ;;  %379 = vmatpush.msra.mxu1 %v345_v46  ;;  %v455_v33 = vld [vmem:[#allocation5 + $0x140] sm:$0xff] }
  0x5c   : > { %861 = vmatpush.msrb.mxu3 %v354_v34  ;;  %380 = vmatpush.msra.mxu1 %v344_v47 }
  0x5e   : > { %862 = vmatpush.msrb.mxu3 %v353_v35  ;;  %v454_v35 = vld [vmem:[#allocation5 + $0x138] sm:$0xff] }
  0x60   : > { %863 = vmatpush.msrb.mxu3 %v352_v36  ;;  %v453_v36 = vld [vmem:[#allocation5 + $0x130] sm:$0xff] }
  0x61   : > { %284 = vmatmul.f32.gmra.mxu0 %v228_v19  ;;  %320 = vmatmul.f32.gmra.mxu3 %v240_v22  ;;  %v461_v22 = vld [vmem:[#allocation5 + $0x170] sm:$0xff] }
  0x62   : > { %864 = vmatpush.msrb.mxu3 %v351_v38 }
  0x64   : > { %865 = vmatpush.msrb.mxu3 %v350_v39 }
  0x66   : > { %866 = vmatpush.msrb.mxu3 %v349_v40  ;;  %v451_v40 = vld [vmem:[#allocation5 + $0x120] sm:$0xff] }
  0x68   : > { %867 = vmatpush.msrb.mxu3 %v348_v41 }
  0x69   : > { %287 = vmatmul.f32.gmra.mxu0 %v229_v21  ;;  %323 = vmatmul.f32.gmra.mxu3 %v241_v24  ;;  %v462_v21 = vld [vmem:[#allocation5 + $0x178] sm:$0xff] }
  0x6a   : > { %868 = vmatpush.msrb.mxu3 %v347_v43  ;;  %468 = vmatpush.msra.mxu2 %v462_v21 }
  0x6c   : > { %869 = vmatpush.msrb.mxu3 %v346_v45  ;;  %469 = vmatpush.msra.mxu2 %v461_v22 }
  0x6e   : > { %870 = vmatpush.msrb.mxu3 %v345_v46  ;;  %v449_v46 = vld [vmem:[#allocation5 + $0x110] sm:$0xff] }
  0x70   : > { %871 = vmatpush.msrb.mxu3 %v344_v47  ;;  %v448_v47 = vld [vmem:[#allocation5 + $0x108] sm:$0xff] }
  0x71   : > { %290 = vmatmul.f32.gmra.mxu0 %v230_v23  ;;  %v460_v23 = vld [vmem:[#allocation5 + $0x168] sm:$0xff] }
  0x72   : > { %872 = vmatpush.msra.mxu3 %v462_v21  ;;  %470 = vmatpush.msra.mxu2 %v460_v23 }
  0x74   : > { %873 = vmatpush.msra.mxu3 %v461_v22 }
  0x76   : > { %874 = vmatpush.msra.mxu3 %v460_v23 }
  0x79   : > { %293 = vmatmul.f32.gmra.mxu0 %v231_v25 }
  0x81   : > { %296 = vmatmul.f32.gmra.mxu0 %v232_v26  ;;  %v459_v26 = vld [vmem:[#allocation5 + $0x160] sm:$0xff] }
  0x82   : > { %471 = vmatpush.msra.mxu2 %v459_v26  ;;  %875 = vmatpush.msra.mxu3 %v459_v26 }
  0x84   : > { %472 = vmatpush.msra.mxu2 %v458_v28  ;;  %876 = vmatpush.msra.mxu3 %v458_v28 }
  0x86   : > { %473 = vmatpush.msra.mxu2 %v457_v29  ;;  %877 = vmatpush.msra.mxu3 %v457_v29 }
  0x88   : > { %474 = vmatpush.msra.mxu2 %v456_v30  ;;  %878 = vmatpush.msra.mxu3 %v456_v30 }
  0x89   : > { %299 = vmatmul.f32.gmra.mxu0 %v233_v27 }
  0x8a   : > { %475 = vmatpush.msra.mxu2 %v455_v33  ;;  %879 = vmatpush.msra.mxu3 %v455_v33 }
  0x8c   : > { %476 = vmatpush.msra.mxu2 %v454_v35  ;;  %880 = vmatpush.msra.mxu3 %v454_v35 }
  0x8e   : > { %477 = vmatpush.msra.mxu2 %v453_v36  ;;  %881 = vmatpush.msra.mxu3 %v453_v36  ;;  %v1372_v36 = vld [vmem:[#allocation7 + $0x2] ss:$0 sm:$0xff] }
  0x91   : > { %302 = vmatmul.f32.gmra.mxu0 %v234_v32 }
  0x99   : > { %305 = vmatmul.f32.gmra.mxu0 %v235_v37  ;;  %v452_v37 = vld [vmem:[#allocation5 + $0x128] sm:$0xff] }
  0x9a   : > { %478 = vmatpush.msra.mxu2 %v452_v37  ;;  %882 = vmatpush.msra.mxu3 %v452_v37 }
  0x9c   : > { %479 = vmatpush.msra.mxu2 %v451_v40  ;;  %883 = vmatpush.msra.mxu3 %v451_v40 }
  0xa1   : > { %308 = vmatmul.f32.gmra.mxu0 %v236_v42  ;;  %v450_v42 = vld [vmem:[#allocation5 + $0x118] sm:$0xff] }
  0xa2   : > { %480 = vmatpush.msra.mxu2 %v450_v42  ;;  %884 = vmatpush.msra.mxu3 %v450_v42 }
  0xa4   : > { %481 = vmatpush.msra.mxu2 %v449_v46  ;;  %885 = vmatpush.msra.mxu3 %v449_v46 }
  0xa6   : > { %482 = vmatpush.msra.mxu2 %v448_v47  ;;  %886 = vmatpush.msra.mxu3 %v448_v47 }
  0xa9   : > { %311 = vmatmul.f32.gmra.mxu0 %v237_v44 }
  0xce   : > { %v279_v49 = vpop.f32.mrf.mxu0 }
  0xcf   : > { %v280_v50 = vadd.f32 %v1352_v48, %v279_v49  ;;  %v447_v49 = vld [vmem:[#allocation5 + $0x100] sm:$0xff] }
  0xd0   : > { %483 = vmatpush.msra.mxu2 %v447_v49  ;;  %887 = vmatpush.msra.mxu3 %v447_v49 }
  0xd1   : > { %v327_v51 = vmax.f32 %v280_v50, 0.0  ;;  %v962_v50 = vld [vmem:[#allocation7 + $0x1] ss:$0 sm:$0xff] }
  0xd3   : > { %381 = vmatmul.f32.vlgmr.msra.gmra.mxu1 %v327_v51 }
  0xd4   : > { %v315_v52 = vpop.f32.mrf.mxu3 }
  0xd5   : > { %v316_v53 = vadd.f32 %v1352_v48, %v315_v52 }
  0xd6   : > { %v282_v54 = vpop.f32.mrf.mxu0 }
  0xd7   : > { %v283_v55 = vadd.f32 %v1352_v48, %v282_v54  ;;  %v339_v56 = vmax.f32 %v316_v53, 0.0 }
  0xd9   : > { %v328_v57 = vmax.f32 %v283_v55, 0.0  ;;  %417 = vmatmul.f32.vlgmr.msrb.gmra.mxu3 %v339_v56 }
  0xdb   : > { %384 = vmatmul.f32.gmra.mxu1 %v328_v57 }
  0xdc   : > { %v318_v63 = vpop.f32.mrf.mxu3 }
  0xdd   : > { %v319_v1 = vadd.f32 %v1352_v48, %v318_v63 }
  0xde   : > { %v285_v58 = vpop.f32.mrf.mxu0 }
  0xdf   : > { %v286_v59 = vadd.f32 %v1352_v48, %v285_v58  ;;  %v340_v2 = vmax.f32 %v319_v1, 0.0 }
  0xe1   : > { %v329_v60 = vmax.f32 %v286_v59, 0.0  ;;  %420 = vmatmul.f32.gmra.mxu3 %v340_v2 }
  0xe3   : > { %387 = vmatmul.f32.gmra.mxu1 %v329_v60 }
  0xe4   : > { %v321_v5 = vpop.f32.mrf.mxu3 }
  0xe5   : > { %v322_v7 = vadd.f32 %v1352_v48, %v321_v5 }
  0xe6   : > { %v288_v61 = vpop.f32.mrf.mxu0 }
  0xe7   : > { %v289_v62 = vadd.f32 %v1352_v48, %v288_v61  ;;  %v341_v8 = vmax.f32 %v322_v7, 0.0 }
  0xe9   : > { %v330_v0 = vmax.f32 %v289_v62, 0.0  ;;  %423 = vmatmul.f32.gmra.mxu3 %v341_v8 }
  0xeb   : > { %390 = vmatmul.f32.gmra.mxu1 %v330_v0 }
  0xec   : > { %v324_v11 = vpop.f32.mrf.mxu3 }
  0xed   : > { %v325_v13 = vadd.f32 %v1352_v48, %v324_v11 }
  0xee   : > { %v291_v3 = vpop.f32.mrf.mxu0 }
  0xef   : > { %v292_v4 = vadd.f32 %v1352_v48, %v291_v3  ;;  %v342_v14 = vmax.f32 %v325_v13, 0.0 }
  0xf1   : > { %v331_v6 = vmax.f32 %v292_v4, 0.0  ;;  %426 = vmatmul.f32.gmra.mxu3 %v342_v14 }
  0xf3   : > { %393 = vmatmul.f32.gmra.mxu1 %v331_v6 }
  0xf6   : > { %v294_v9 = vpop.f32.mrf.mxu0 }
  0xf7   : > { %v295_v10 = vadd.f32 %v1352_v48, %v294_v9 }
  0xf9   : > { %v332_v12 = vmax.f32 %v295_v10, 0.0 }
  0xfb   : > { %396 = vmatmul.f32.gmra.mxu1 %v332_v12 }
  0xfe   : > { %v297_v15 = vpop.f32.mrf.mxu0 }
  0xff   : > { %v298_v16 = vadd.f32 %v1352_v48, %v297_v15 }
 0x101   : > { %v333_v17 = vmax.f32 %v298_v16, 0.0 }
 0x103   : > { %399 = vmatmul.f32.gmra.mxu1 %v333_v17 }
 0x106   : > { %v300_v18 = vpop.f32.mrf.mxu0 }
 0x107   : > { %v301_v19 = vadd.f32 %v1352_v48, %v300_v18 }
 0x109   : > { %v334_v20 = vmax.f32 %v301_v19, 0.0 }
 0x10b   : > { %402 = vmatmul.f32.gmra.mxu1 %v334_v20 }
 0x10e   : > { %v303_v24 = vpop.f32.mrf.mxu0 }
 0x10f   : > { %v304_v25 = vadd.f32 %v1352_v48, %v303_v24 }
 0x111   : > { %v335_v27 = vmax.f32 %v304_v25, 0.0 }
 0x113   : > { %405 = vmatmul.f32.gmra.mxu1 %v335_v27 }
 0x116   : > { %v306_v31 = vpop.f32.mrf.mxu0 }
 0x117   : > { %v307_v32 = vadd.f32 %v1352_v48, %v306_v31 }
 0x119   : > { %v336_v34 = vmax.f32 %v307_v32, 0.0 }
 0x11b   : > { %408 = vmatmul.f32.gmra.mxu1 %v336_v34  ;;  %v533_v34 = vlaneseq }
 0x11d   : > { %v1370_v35 = vand.u32 127, %v533_v34 }
 0x11e   : > { %v309_v38 = vpop.f32.mrf.mxu0 }
 0x11f   : > { %v310_v39 = vadd.f32 %v1352_v48, %v309_v38  ;;  %vm535_vm0 = vcmp.lt.s32.totalorder %v1370_v35, 8 }
 0x121   : > { %v337_v41 = vmax.f32 %v310_v39, 0.0 }
 0x123   : > { %411 = vmatmul.f32.gmra.mxu1 %v337_v41 }
 0x126   : > { %v312_v43 = vpop.f32.mrf.mxu0 }
 0x127   : > { %v313_v44 = vadd.f32 %v1352_v48, %v312_v43 }
 0x129   : > { %v338_v45 = vmax.f32 %v313_v44, 0.0 }
 0x12b   : > { %414 = vmatmul.f32.gmra.mxu1 %v338_v45 }
 0x150   : > { %v382_v51 = vpop.f32.mrf.mxu1 }
 0x151   : > { %v383_v52 = vadd.f32 %v962_v50, %v382_v51 }
 0x153   : > { %v430_v53 = vmax.f32 %v383_v52, 0.0 }
 0x155   : > { %484 = vmatmul.f32.vlgmr.msra.gmra.mxu2 %v430_v53 }
 0x158   : > { %v385_v54 = vpop.f32.mrf.mxu1 }
 0x159   : > { %v386_v55 = vadd.f32 %v962_v50, %v385_v54 }
 0x15b   : > { %v431_v56 = vmax.f32 %v386_v55, 0.0 }
 0x15c   : > { %v418_v48 = vpop.f32.mrf.mxu3 }
 0x15d   : > { %487 = vmatmul.f32.gmra.mxu2 %v431_v56  ;;  %v419_v57 = vadd.f32 %v962_v50, %v418_v48 }
 0x15f   : > { %v442_v58 = vmax.f32 %v419_v57, 0.0 }
 0x160   : > { %v388_v59 = vpop.f32.mrf.mxu1 }
 0x161   : > { %v389_v60 = vadd.f32 %v962_v50, %v388_v59  ;;  %520 = vmatmul.f32.vlgmr.msra.gmra.mxu3 %v442_v58 }
 0x163   : > { %v432_v61 = vmax.f32 %v389_v60, 0.0 }
 0x164   : > { %v421_v2 = vpop.f32.mrf.mxu3 }
 0x165   : > { %490 = vmatmul.f32.gmra.mxu2 %v432_v61  ;;  %v422_v4 = vadd.f32 %v962_v50, %v421_v2 }
 0x167   : > { %v443_v6 = vmax.f32 %v422_v4, 0.0 }
 0x168   : > { %v391_v62 = vpop.f32.mrf.mxu1 }
 0x169   : > { %v392_v63 = vadd.f32 %v962_v50, %v391_v62  ;;  %523 = vmatmul.f32.gmra.mxu3 %v443_v6 }
 0x16b   : > { %v433_v0 = vmax.f32 %v392_v63, 0.0 }
 0x16c   : > { %v424_v8 = vpop.f32.mrf.mxu3 }
 0x16d   : > { %493 = vmatmul.f32.gmra.mxu2 %v433_v0  ;;  %v425_v10 = vadd.f32 %v962_v50, %v424_v8 }
 0x16f   : > { %v444_v12 = vmax.f32 %v425_v10, 0.0 }
 0x170   : > { %v394_v1 = vpop.f32.mrf.mxu1 }
 0x171   : > { %v395_v3 = vadd.f32 %v962_v50, %v394_v1  ;;  %526 = vmatmul.f32.gmra.mxu3 %v444_v12 }
 0x173   : > { %v434_v5 = vmax.f32 %v395_v3, 0.0 }
 0x174   : > { %v427_v14 = vpop.f32.mrf.mxu3 }
 0x175   : > { %496 = vmatmul.f32.gmra.mxu2 %v434_v5  ;;  %v428_v16 = vadd.f32 %v962_v50, %v427_v14 }
 0x177   : > { %v445_v18 = vmax.f32 %v428_v16, 0.0 }
 0x178   : > { %v397_v7 = vpop.f32.mrf.mxu1 }
 0x179   : > { %v398_v9 = vadd.f32 %v962_v50, %v397_v7  ;;  %529 = vmatmul.f32.gmra.mxu3 %v445_v18 }
 0x17b   : > { %v435_v11 = vmax.f32 %v398_v9, 0.0 }
 0x17d   : > { %499 = vmatmul.f32.gmra.mxu2 %v435_v11 }
 0x180   : > { %v400_v13 = vpop.f32.mrf.mxu1 }
 0x181   : > { %v401_v15 = vadd.f32 %v962_v50, %v400_v13 }
 0x183   : > { %v436_v17 = vmax.f32 %v401_v15, 0.0 }
 0x185   : > { %502 = vmatmul.f32.gmra.mxu2 %v436_v17 }
 0x188   : > { %v403_v19 = vpop.f32.mrf.mxu1 }
 0x189   : > { %v404_v20 = vadd.f32 %v962_v50, %v403_v19 }
 0x18b   : > { %v437_v21 = vmax.f32 %v404_v20, 0.0 }
 0x18d   : > { %505 = vmatmul.f32.gmra.mxu2 %v437_v21 }
 0x190   : > { %v406_v22 = vpop.f32.mrf.mxu1 }
 0x191   : > { %v407_v23 = vadd.f32 %v962_v50, %v406_v22 }
 0x193   : > { %v438_v24 = vmax.f32 %v407_v23, 0.0 }
 0x195   : > { %508 = vmatmul.f32.gmra.mxu2 %v438_v24 }
 0x198   : > { %v409_v25 = vpop.f32.mrf.mxu1 }
 0x199   : > { %v410_v26 = vadd.f32 %v962_v50, %v409_v25 }
 0x19b   : > { %v439_v27 = vmax.f32 %v410_v26, 0.0 }
 0x19d   : > { %511 = vmatmul.f32.gmra.mxu2 %v439_v27 }
 0x1a0   : > { %v412_v28 = vpop.f32.mrf.mxu1 }
 0x1a1   : > { %v413_v29 = vadd.f32 %v962_v50, %v412_v28 }
 0x1a3   : > { %v440_v30 = vmax.f32 %v413_v29, 0.0 }
 0x1a5   : > { %514 = vmatmul.f32.gmra.mxu2 %v440_v30 }
 0x1a8   : > { %v415_v31 = vpop.f32.mrf.mxu1 }
 0x1a9   : > { %v416_v32 = vadd.f32 %v962_v50, %v415_v31 }
 0x1ab   : > { %v441_v33 = vmax.f32 %v416_v32, 0.0 }
 0x1ad   : > { %517 = vmatmul.f32.gmra.mxu2 %v441_v33 }
 0x1d8   : > { %v485_v37 = vpop.f32.mrf.mxu2 }
 0x1d9   : > { %v486_v38 = vadd.f32 %v1372_v36, %v485_v37 }
 0x1db   : > { %v1378_v39 = vsel %vm535_vm0, %v486_v38, -1e+30 }
 0x1dc   : > { %552 = vmax.xlane.f32.xlu0 %v1378_v39 }
 0x1e0   : > { %v488_v40 = vpop.f32.mrf.mxu2 }
 0x1e1   : > { %v489_v41 = vadd.f32 %v1372_v36, %v488_v40 }
 0x1e3   : > { %v1384_v42 = vsel %vm535_vm0, %v489_v41, -1e+30 }
 0x1e4   : > { %554 = vmax.xlane.f32.xlu0 %v1384_v42  ;;  %v521_v43 = vpop.f32.mrf.mxu3 }
 0x1e5   : > { %v522_v44 = vadd.f32 %v1372_v36, %v521_v43 }
 0x1e7   : > { %v1391_v47 = vsel %vm535_vm0, %v522_v44, -1e+30 }
 0x1e8   : > { %v491_v45 = vpop.f32.mrf.mxu2 }
 0x1e9   : > { %v492_v46 = vadd.f32 %v1372_v36, %v491_v45 }
 0x1eb   : > { %v1395_v49 = vsel %vm535_vm0, %v492_v46, -1e+30 }
 0x1ec   : > { %556 = vmax.xlane.f32.xlu1 %v1395_v49  ;;  %576 = vmax.xlane.f32.xlu0 %v1391_v47  ;;  %v524_v61 = vpop.f32.mrf.mxu3 }
 0x1ed   : > { %v525_v14 = vadd.f32 %v1372_v36, %v524_v61 }
 0x1ef   : > { %v1461_v18 = vsel %vm535_vm0, %v525_v14, -1e+30 }
 0x1f0   : > { %v494_v50 = vpop.f32.mrf.mxu2 }
 0x1f1   : > { %v495_v51 = vadd.f32 %v1372_v36, %v494_v50 }
 0x1f3   : > { %v1402_v52 = vsel %vm535_vm0, %v495_v51, -1e+30 }
 0x1f4   : > { %558 = vmax.xlane.f32.xlu1 %v1402_v52  ;;  %v527_v2 = vpop.f32.mrf.mxu3 }
 0x1f5   : > { %v528_v19 = vadd.f32 %v1372_v36, %v527_v2 }
 0x1f7   : > { %v1468_v20 = vsel %vm535_vm0, %v528_v19, -1e+30 }
 0x1f8   : > { %v497_v53 = vpop.f32.mrf.mxu2 }
 0x1f9   : > { %v498_v54 = vadd.f32 %v1372_v36, %v497_v53 }
 0x1fb   : > { %v1408_v55 = vsel %vm535_vm0, %v498_v54, -1e+30 }
 0x1fc   : > { %560 = vmax.xlane.f32.xlu2 %v1408_v55  ;;  %v530_v7 = vpop.f32.mrf.mxu3 }
 0x1fd   : > { %v531_v9 = vadd.f32 %v1372_v36, %v530_v7 }
 0x1ff   : > { %v1445_v12 = vsel %vm535_vm0, %v531_v9, -1e+30 }
 0x200   : > { %v500_v56 = vpop.f32.mrf.mxu2 }
 0x201   : > { %v501_v48 = vadd.f32 %v1372_v36, %v500_v56 }
 0x203   : > { %v1414_v57 = vsel %vm535_vm0, %v501_v48, -1e+30 }
 0x204   : > { %562 = vmax.xlane.f32.xlu2 %v1414_v57 }
 0x208   : > { %v503_v58 = vpop.f32.mrf.mxu2 }
 0x209   : > { %v504_v59 = vadd.f32 %v1372_v36, %v503_v58 }
 0x20b   : > { %v1420_v60 = vsel %vm535_vm0, %v504_v59, -1e+30 }
 0x20c   : > { %564 = vmax.xlane.f32.xlu0 %v1420_v60 }
 0x210   : > { %v506_v62 = vpop.f32.mrf.mxu2 }
 0x211   : > { %v507_v63 = vadd.f32 %v1372_v36, %v506_v62 }
 0x213   : > { %v1426_v0 = vsel %vm535_vm0, %v507_v63, -1e+30 }
 0x214   : > { %566 = vmax.xlane.f32.xlu1 %v1426_v0 }
 0x218   : > { %v509_v1 = vpop.f32.mrf.mxu2 }
 0x219   : > { %v510_v3 = vadd.f32 %v1372_v36, %v509_v1 }
 0x21b   : > { %v1432_v4 = vsel %vm535_vm0, %v510_v3, -1e+30 }
 0x21c   : > { %568 = vmax.xlane.f32.xlu2 %v1432_v4 }
 0x220   : > { %v512_v5 = vpop.f32.mrf.mxu2 }
 0x221   : > { %v513_v6 = vadd.f32 %v1372_v36, %v512_v5 }
 0x223   : > { %v1438_v8 = vsel %vm535_vm0, %v513_v6, -1e+30 }
 0x224   : > { %570 = vmax.xlane.f32.xlu0 %v1438_v8 }
 0x228   : > { %v515_v10 = vpop.f32.mrf.mxu2 }
 0x229   : > { %v516_v11 = vadd.f32 %v1372_v36, %v515_v10 }
 0x22b   : > { %v1449_v13 = vsel %vm535_vm0, %v516_v11, -1e+30 }
 0x22c   : > { %572 = vmax.xlane.f32.xlu1 %v1449_v13  ;;  %582 = vmax.xlane.f32.xlu0 %v1445_v12 }
 0x230   : > { %v518_v15 = vpop.f32.mrf.mxu2 }
 0x231   : > { %v519_v16 = vadd.f32 %v1372_v36, %v518_v15 }
 0x233   : > { %v1457_v17 = vsel %vm535_vm0, %v519_v16, -1e+30 }
 0x234   : > { %574 = vmax.xlane.f32.xlu2 %v1457_v17  ;;  %578 = vmax.xlane.f32.xlu1 %v1461_v18 }
 0x23c   : > { %580 = vmax.xlane.f32.xlu2 %v1468_v20 }
 0x24f   : > { %v553_v21 = vpop.xlane.xlu0 %552 }
 0x250   : > { %v584_v22 = vsub.f32 %v1378_v39, %v553_v21 }
 0x252   : > { %v600_v23 = vmul.f32 1.442695, %v584_v22 }
 0x254   : > { %964 = vpow2.f32 %v600_v23 }
 0x257   : > { %v555_v24 = vpop.xlane.xlu0 %554 }
 0x258   : > { %v585_v25 = vsub.f32 %v1384_v42, %v555_v24 }
 0x25a   : > { %v1473_v26 = vpop.eup %964  ;;  %v602_v27 = vmul.f32 1.442695, %v585_v25 }
 0x25b   : > { %632 = vadd.xlane.f32.xlu1 %v1473_v26 }
 0x25c   : > { %966 = vpow2.f32 %v602_v27 }
 0x25f   : > { %v557_v28 = vpop.xlane.xlu1 %556  ;;  %v577_v29 = vpop.xlane.xlu0 %576 }
 0x260   : > { %v586_v30 = vsub.f32 %v1395_v49, %v557_v28  ;;  %v596_v31 = vsub.f32 %v1391_v47, %v577_v29 }
 0x262   : > { %v1478_v32 = vpop.eup %966  ;;  %v604_v33 = vmul.f32 1.442695, %v586_v30  ;;  %v624_v34 = vmul.f32 1.442695, %v596_v31 }
 0x263   : > { %634 = vadd.xlane.f32.xlu2 %v1478_v32 }
 0x264   : > { %968 = vpow2.f32 %v604_v33 }
 0x265   : > { %970 = vpow2.f32 %v624_v34 }
 0x267   : > { %v559_v35 = vpop.xlane.xlu1 %558 }
 0x268   : > { %v587_v36 = vsub.f32 %v1402_v52, %v559_v35 }
 0x26a   : > { %v1482_v37 = vpop.eup %968  ;;  %v606_v38 = vmul.f32 1.442695, %v587_v36 }
 0x26b   : > { %v1484_v39 = vpop.eup %970  ;;  %636 = vadd.xlane.f32.xlu0 %v1482_v37 }
 0x26c   : > { %972 = vpow2.f32 %v606_v38  ;;  %656 = vadd.xlane.f32.xlu1 %v1484_v39 }
 0x26f   : > { %v561_v40 = vpop.xlane.xlu2 %560 }
 0x270   : > { %v588_v41 = vsub.f32 %v1408_v55, %v561_v40 }
 0x272   : > { %v1489_v42 = vpop.eup %972  ;;  %v608_v43 = vmul.f32 1.442695, %v588_v41 }
 0x274   : > { %974 = vpow2.f32 %v608_v43  ;;  %638 = vadd.xlane.f32.xlu1 %v1489_v42 }
 0x277   : > { %v563_v44 = vpop.xlane.xlu2 %562 }
 0x278   : > { %v589_v45 = vsub.f32 %v1414_v57, %v563_v44 }
 0x27a   : > { %v1493_v46 = vpop.eup %974  ;;  %v610_v47 = vmul.f32 1.442695, %v589_v45 }
 0x27b   : > { %640 = vadd.xlane.f32.xlu2 %v1493_v46 }
 0x27c   : > { %976 = vpow2.f32 %v610_v47 }
 0x27f   : > { %v565_v49 = vpop.xlane.xlu0 %564 }
 0x280   : > { %v590_v50 = vsub.f32 %v1420_v60, %v565_v49 }
 0x282   : > { %v1497_v51 = vpop.eup %976  ;;  %v612_v52 = vmul.f32 1.442695, %v590_v50 }
 0x283   : > { %642 = vadd.xlane.f32.xlu0 %v1497_v51 }
 0x284   : > { %978 = vpow2.f32 %v612_v52 }
 0x287   : > { %v567_v53 = vpop.xlane.xlu1 %566 }
 0x288   : > { %v591_v54 = vsub.f32 %v1426_v0, %v567_v53 }
 0x28a   : > { %v1501_v55 = vpop.eup %978  ;;  %v614_v56 = vmul.f32 1.442695, %v591_v54 }
 0x28b   : > { %644 = vadd.xlane.f32.xlu1 %v1501_v55 }
 0x28c   : > { %980 = vpow2.f32 %v614_v56 }
 0x28f   : > { %v569_v48 = vpop.xlane.xlu2 %568 }
 0x290   : > { %v592_v57 = vsub.f32 %v1432_v4, %v569_v48 }
 0x292   : > { %v1505_v58 = vpop.eup %980  ;;  %v616_v59 = vmul.f32 1.442695, %v592_v57 }
 0x293   : > { %646 = vadd.xlane.f32.xlu2 %v1505_v58 }
 0x294   : > { %982 = vpow2.f32 %v616_v59 }
 0x297   : > { %v571_v60 = vpop.xlane.xlu0 %570 }
 0x298   : > { %v593_v61 = vsub.f32 %v1438_v8, %v571_v60 }
 0x29a   : > { %v1509_v62 = vpop.eup %982  ;;  %v618_v63 = vmul.f32 1.442695, %v593_v61 }
 0x29b   : > { %648 = vadd.xlane.f32.xlu0 %v1509_v62 }
 0x29c   : > { %984 = vpow2.f32 %v618_v63 }
 0x29f   : > { %v573_v0 = vpop.xlane.xlu1 %572  ;;  %v583_v1 = vpop.xlane.xlu0 %582 }
 0x2a0   : > { %v594_v2 = vsub.f32 %v1449_v13, %v573_v0  ;;  %v599_v3 = vsub.f32 %v1445_v12, %v583_v1 }
 0x2a2   : > { %v1514_v4 = vpop.eup %984  ;;  %v620_v5 = vmul.f32 1.442695, %v594_v2  ;;  %v630_v6 = vmul.f32 1.442695, %v599_v3 }
 0x2a3   : > { %650 = vadd.xlane.f32.xlu1 %v1514_v4 }
 0x2a4   : > { %986 = vpow2.f32 %v620_v5 }
 0x2a5   : > { %988 = vpow2.f32 %v630_v6 }
 0x2a7   : > { %v575_v7 = vpop.xlane.xlu2 %574  ;;  %v579_v8 = vpop.xlane.xlu1 %578 }
 0x2a8   : > { %v595_v9 = vsub.f32 %v1457_v17, %v575_v7  ;;  %v597_v10 = vsub.f32 %v1461_v18, %v579_v8 }
 0x2aa   : > { %v1519_v11 = vpop.eup %986  ;;  %v622_v14 = vmul.f32 1.442695, %v595_v9  ;;  %v626_v13 = vmul.f32 1.442695, %v597_v10 }
 0x2ab   : > { %v1521_v15 = vpop.eup %988  ;;  %652 = vadd.xlane.f32.xlu2 %v1519_v11 }
 0x2ac   : > { %990 = vpow2.f32 %v622_v14  ;;  %662 = vadd.xlane.f32.xlu1 %v1521_v15 }
 0x2ad   : > { %992 = vpow2.f32 %v626_v13 }
 0x2af   : > { %v581_v12 = vpop.xlane.xlu2 %580 }
 0x2b0   : > { %v598_v16 = vsub.f32 %v1468_v20, %v581_v12 }
 0x2b2   : > { %v1526_v19 = vpop.eup %990  ;;  %v628_v17 = vmul.f32 1.442695, %v598_v16 }
 0x2b3   : > { %v1528_v18 = vpop.eup %992  ;;  %654 = vadd.xlane.f32.xlu0 %v1526_v19 }
 0x2b4   : > { %994 = vpow2.f32 %v628_v17  ;;  %658 = vadd.xlane.f32.xlu2 %v1528_v18 }
 0x2ba   : > { %v1532_v21 = vpop.eup %994 }
 0x2bb   : > { %660 = vadd.xlane.f32.xlu0 %v1532_v21 }
 0x2ce   : > { %v633_v22 = vpop.xlane.xlu1 %632 }
 0x2cf   : > { %996 = vrcp.f32 %v633_v22 }
 0x2d5   : > { %v997_v23 = vpop.eup %996 }
 0x2d6   : > { %v680_v24 = vmul.f32 %v997_v23, %v1473_v26  ;;  %v635_v20 = vpop.xlane.xlu2 %634 }
 0x2d7   : > { %998 = vrcp.f32 %v635_v20 }
 0x2d8   : > { %696 = vst [vmem:[%s1538_s18] sm:$0xff] %v680_v24 }
 0x2dd   : > { %v999_v25 = vpop.eup %998 }
 0x2de   : > { %v681_v27 = vmul.f32 %v999_v25, %v1478_v32  ;;  %v637_v28 = vpop.xlane.xlu0 %636 }
 0x2df   : > { %v657_v29 = vpop.xlane.xlu1 %656  ;;  %1000 = vrcp.f32 %v637_v28 }
 0x2e0   : > { %697 = vst [vmem:[%s1538_s18 + $0x8] sm:$0xff] %v681_v27  ;;  %1002 = vrcp.f32 %v657_v29 }
 0x2e5   : > { %v1001_v26 = vpop.eup %1000 }
 0x2e6   : > { %v1003_v30 = vpop.eup %1002  ;;  %v682_v31 = vmul.f32 %v1001_v26, %v1482_v37 }
 0x2e7   : > { %v692_v33 = vmul.f32 %v1003_v30, %v1484_v39  ;;  %v639_v34 = vpop.xlane.xlu1 %638 }
 0x2e8   : > { %698 = vst [vmem:[%s1538_s18 + $0x10] sm:$0xff] %v682_v31  ;;  %1004 = vrcp.f32 %v639_v34 }
 0x2e9   : > { %708 = vst [vmem:[%s1538_s18 + $0x60] sm:$0xff] %v692_v33 }
 0x2ee   : > { %v1005_v35 = vpop.eup %1004  ;;  %v641_v32 = vpop.xlane.xlu2 %640 }
 0x2ef   : > { %v683_v36 = vmul.f32 %v1005_v35, %v1489_v42  ;;  %1006 = vrcp.f32 %v641_v32 }
 0x2f1   : > { %699 = vst [vmem:[%s1538_s18 + $0x18] sm:$0xff] %v683_v36 }
 0x2f5   : > { %v1007_v38 = vpop.eup %1006 }
 0x2f6   : > { %v684_v40 = vmul.f32 %v1007_v38, %v1493_v46  ;;  %v643_v41 = vpop.xlane.xlu0 %642 }
 0x2f7   : > { %1008 = vrcp.f32 %v643_v41 }
 0x2f8   : > { %700 = vst [vmem:[%s1538_s18 + $0x20] sm:$0xff] %v684_v40 }
 0x2fd   : > { %v1009_v37 = vpop.eup %1008 }
 0x2fe   : > { %v685_v39 = vmul.f32 %v1009_v37, %v1497_v51  ;;  %v645_v43 = vpop.xlane.xlu1 %644 }
 0x2ff   : > { %1010 = vrcp.f32 %v645_v43 }
 0x300   : > { %701 = vst [vmem:[%s1538_s18 + $0x28] sm:$0xff] %v685_v39 }
 0x305   : > { %v1011_v44 = vpop.eup %1010 }
 0x306   : > { %v686_v42 = vmul.f32 %v1011_v44, %v1501_v55  ;;  %v647_v45 = vpop.xlane.xlu2 %646 }
 0x307   : > { %1012 = vrcp.f32 %v647_v45 }
 0x308   : > { %702 = vst [vmem:[%s1538_s18 + $0x30] sm:$0xff] %v686_v42 }
 0x30d   : > { %v1013_v47 = vpop.eup %1012 }
 0x30e   : > { %v687_v46 = vmul.f32 %v1013_v47, %v1505_v58  ;;  %v649_v49 = vpop.xlane.xlu0 %648 }
 0x30f   : > { %1014 = vrcp.f32 %v649_v49 }
 0x310   : > { %703 = vst [vmem:[%s1538_s18 + $0x38] sm:$0xff] %v687_v46 }
 0x315   : > { %v1015_v50 = vpop.eup %1014 }
 0x316   : > { %v688_v51 = vmul.f32 %v1015_v50, %v1509_v62  ;;  %v651_v52 = vpop.xlane.xlu1 %650 }
 0x317   : > { %1016 = vrcp.f32 %v651_v52 }
 0x318   : > { %704 = vst [vmem:[%s1538_s18 + $0x40] sm:$0xff] %v688_v51 }
 0x31d   : > { %v1017_v53 = vpop.eup %1016 }
 0x31e   : > { %v689_v54 = vmul.f32 %v1017_v53, %v1514_v4  ;;  %v653_v55 = vpop.xlane.xlu2 %652 }
 0x31f   : > { %1018 = vrcp.f32 %v653_v55  ;;  %v663_v56 = vpop.xlane.xlu1 %662 }
 0x320   : > { %705 = vst [vmem:[%s1538_s18 + $0x48] sm:$0xff] %v689_v54  ;;  %1020 = vrcp.f32 %v663_v56 }
 0x325   : > { %v1019_v48 = vpop.eup %1018 }
 0x326   : > { %v1021_v57 = vpop.eup %1020  ;;  %v690_v58 = vmul.f32 %v1019_v48, %v1519_v11  ;;  %v655_v59 = vpop.xlane.xlu0 %654 }
 0x327   : > { %v695_v60 = vmul.f32 %v1021_v57, %v1521_v15  ;;  %v659_v61 = vpop.xlane.xlu2 %658  ;;  %1022 = vrcp.f32 %v655_v59 }
 0x328   : > { %706 = vst [vmem:[%s1538_s18 + $0x50] sm:$0xff] %v690_v58  ;;  %1024 = vrcp.f32 %v659_v61 }
 0x329   : > { %711 = vst [vmem:[%s1538_s18 + $0x78] sm:$0xff] %v695_v60 }
 0x32d   : > { %v1023_v62 = vpop.eup %1022 }
 0x32e   : > { %v1025_v63 = vpop.eup %1024  ;;  %v691_v0 = vmul.f32 %v1023_v62, %v1526_v19  ;;  %v661_v1 = vpop.xlane.xlu0 %660 }
 0x32f   : > { %v693_v2 = vmul.f32 %v1025_v63, %v1528_v18  ;;  %1026 = vrcp.f32 %v661_v1 }
 0x330   : > { %707 = vst [vmem:[%s1538_s18 + $0x58] sm:$0xff] %v691_v0 }
 0x331   : > { %709 = vst [vmem:[%s1538_s18 + $0x68] sm:$0xff] %v693_v2 }
 0x335   : > { %v1027_v3 = vpop.eup %1026 }
 0x336   : > { %v694_v4 = vmul.f32 %v1027_v3, %v1532_v21 }
 0x338   : > { %710 = vst [vmem:[%s1538_s18 + $0x70] sm:$0xff] %v694_v4 }
 0x339   : > { %1145 = shalt.err (!%p1142_p10)
}
 0x33a   : > { %s1196_s20 = smov 128   ;;  %s1197_s26 = smov 8  }
 0x33b   : > { %898 = dma.vmem_to_hbm [thread:$0]  (%p1290_p5), %s726_s4, 2048, %s728_s5, %s713_s16, %s1196_s20, %s1196_s20, %s1197_s26  }
 0x33c PF: > { %s742_s27 = sand.u32 1, %s1176_s12   ;;  %p1614_p12 = scmp.ge.s32.totalorder %s1188_s15, 2 }
 0x33d   : > { %s743_s7 = scalar_lea.sflag [#allocation4], %s742_s27 }
 0x33e   : > { %p912_p13 = pnand %p1614_p12, %p1253_p6 }
 0x340   : > { %p913_p0 = pneg %p912_p13 }
 0x342   : > { %1171 = dma.done.wait (%p913_p0), %s743_s7, 2048  }
 0x343   : > { %1173 = vsyncadd (%p913_p0), %s743_s7, 4294965248  ;;  %p17_p3 = scmp.ge.s32.totalorder %s1277_s8, 4   ;;  %s1615_s12 = smov %s1180_s13 }
 0x344   : > { %s1616_s13 = smov %s1184_s14  ;;  %s1617_s14 = smov %s1286_s11 }
 0x345   : > { %s1618_s15 = smov %s1277_s8  ;;  %19 = sbr.rel (!%p17_p3) target bundleno = 6 (0x6), region = 89 }
 0x34a   :  { %749 = vsyncpa [#allocation3], 1 }
 0x34b   :  { %751 = vsyncpa [#allocation3 + $0x1], 1 }
 0x34c   :  { %752 = vsyncpa [#allocation6], 1 }
 0x34d   :  { %753 = vsyncpa [#allocation4], 1 }
 0x34e   :  { %755 = vsyncpa [#allocation4 + $0x1], 1 }

</bundles_post_ra>
